<compile_context>
chip_gen: v7x
topology: tpu7x:2x2x1
jax: 0.10.0
libtpu: 0.0.40
codegen_flags: <defaults>
</compile_context>

<pallas_src>
import jax
import jax.numpy as jnp
from jax.experimental import pallas as pl
from jax.experimental.pallas import tpu as pltpu

F1, F2 = 16, 128   # padded hidden sizes (10 -> 16, 100 -> 128)


def mlp_kernel(x_ref, w1_ref, b1_ref, w2_ref, w3_ref, w4_ref, o_ref):
    x = x_ref[...]                                            # (1, TB) f32

    # Layer 1: Linear(1,10) + ReLU on the VPU (K=1 => broadcast multiply).
    # b1 padding row 10 == 1.0, so h1 row 10 is a constant-1 lane (carries folded b2).
    h1 = jnp.maximum(w1_ref[...] * x + b1_ref[...], 0.0)      # (F1, TB) f32

    mx_dt = w2_ref.dtype                                      # bf16 (fast) or f32 (exact)

    # Layer 2: Linear(10,100) + ReLU on the MXU; bias folded into w2 column 10.
    h2 = jnp.dot(w2_ref[...], h1.astype(mx_dt),
                 preferred_element_type=mx_dt)                # (F2, TB)
    h2 = jnp.maximum(h2, 0.0)                                 # row 100 == 1 (carries b3)

    # Layer 3: Linear(100,10) + ReLU on the MXU; bias folded into w3 column 100.
    h3 = jnp.dot(w3_ref[...], h2, preferred_element_type=jnp.float32)
    h3 = jnp.maximum(h3, 0.0)                                 # (F1, TB) f32, row 10 == 1

    # Layer 4: Linear(10,1) on the VPU + sublane (XLU) reduce; bias folded into w4 row 10.
    o_ref[...] = jnp.sum(w4_ref[...] * h3, axis=0,
                         keepdims=True).astype(o_ref.dtype)   # (1, TB)


def _round_up(x, m):
    return (x + m - 1) // m * m


def prepare_params(params, use_bf16=True):
    """Pad/transpose PyTorch-layout params and fold biases 2-4 into the padded weights."""
    w1, b1 = params["w1"], params["b1"]   # (10, 1),   (10,)
    w2, b2 = params["w2"], params["b2"]   # (100, 10), (100,)
    w3, b3 = params["w3"], params["b3"]   # (10, 100), (10,)
    w4, b4 = params["w4"], params["b4"]   # (1, 10),   (1,)
    mx_dt = jnp.bfloat16 if use_bf16 else jnp.float32

    k = {}
    k["w1"] = jnp.zeros((F1, 1), jnp.float32).at[:10, 0].set(w1[:, 0])
    # b1 padding row 10 = 1.0  ->  h1 row 10 is a constant-1 lane after ReLU.
    k["b1"] = (jnp.zeros((F1, 1), jnp.float32).at[:10, 0].set(b1)
               .at[10, 0].set(1.0))
    # b2 folded into w2[:,10] (multiplies the constant-1 row of h1);
    # w2[100,10] = 1.0 keeps a constant-1 lane alive in h2 row 100.
    k["w2"] = (jnp.zeros((F2, F1), jnp.float32).at[:100, :10].set(w2)
               .at[:100, 10].set(b2).at[100, 10].set(1.0)).astype(mx_dt)
    # b3 folded into w3[:,100]; w3[10,100] = 1.0 keeps h3 row 10 == 1.
    k["w3"] = (jnp.zeros((F1, F2), jnp.float32).at[:10, :100].set(w3)
               .at[:10, 100].set(b3).at[10, 100].set(1.0)).astype(mx_dt)
    # b4 folded into w4 row 10 (multiplies the constant-1 row of h3).
    k["w4"] = (jnp.zeros((F1, 1), jnp.float32).at[:10, 0].set(w4[0, :])
               .at[10, 0].set(b4[0]))
    return k


def _pick_tile(n, tile_b):
    """Lane-dense batch tile: single full block for small N, otherwise multiples of 128
    with at least two grid steps so v7x's two TensorCores both get work."""
    if n < 256:
        return max(n, 1)
    two_way = _round_up(pl.cdiv(n, 2), 128)
    return int(min(tile_b, two_way))


def net_forward(x, kparams, tile_b=16384):
    """x: (N, 1) float32.  kparams: output of prepare_params()."""
    n = x.shape[0]
    xt = x.astype(jnp.float32).reshape(1, n)   # free reshape: batch -> lane axis

    tb = _pick_tile(n, tile_b)
    grid = pl.cdiv(n, tb)                      # partial tail tile handled by Pallas

    args = (xt, kparams["w1"], kparams["b1"],
            kparams["w2"], kparams["w3"], kparams["w4"])

    # x/out stream block-by-block; the tiny weights stay VMEM-resident across the grid.
    in_specs = [pl.BlockSpec((1, tb), lambda i: (0, i))] + [
        pl.BlockSpec(a.shape, lambda i: (0, 0)) for a in args[1:]
    ]
    out_spec = pl.BlockSpec((1, tb), lambda i: (0, i))

    flops = 2 * n * (F1 + F1 * F2 + F2 * F1 + F1)
    bytes_accessed = 8 * n + sum(int(a.size) * a.dtype.itemsize for a in args[1:])

    out = pl.pallas_call(
        mlp_kernel,
        out_shape=jax.ShapeDtypeStruct((1, n), jnp.float32),
        grid=(grid,),
        in_specs=in_specs,
        out_specs=out_spec,
        compiler_params=pltpu.CompilerParams(
            dimension_semantics=("parallel",),
            vmem_limit_bytes=48 * 1024 * 1024,   # fits v5e/v6e/v7x; default TB uses ~12 MiB
        ),
        cost_estimate=pl.CostEstimate(
            flops=flops, transcendentals=0, bytes_accessed=bytes_accessed),
    )(*args)

    return out.reshape(n, 1)                   # free reshape, no slice/copy


def init_params(key):
    """Deterministic init matching PyTorch nn.Linear conventions: W (out,in), b (out,)."""
    dims = [(1, 10), (10, 100), (100, 10), (10, 1)]
    params = {}
    for idx, (fan_in, fan_out) in enumerate(dims, start=1):
        key, kw, kb = jax.random.split(key, 3)
        bound = 1.0 / (fan_in ** 0.5)
        params[f"w{idx}"] = jax.random.uniform(
            kw, (fan_out, fan_in), jnp.float32, -bound, bound)
        params[f"b{idx}"] = jax.random.uniform(
            kb, (fan_out,), jnp.float32, -bound, bound)
    return params


if __name__ == "__main__":
    key = jax.random.PRNGKey(0)
    key, kx = jax.random.split(key)

    batch = 8
    x = jax.random.uniform(kx, (batch, 1), jnp.float32, -3.14, 3.14)
    params = init_params(key)

    # Pure-JAX f32 reference (PyTorch semantics: y = x @ W.T + b).
    ref = x
    for i in range(1, 5):
        ref = ref @ params[f"w{i}"].T + params[f"b{i}"]
        if i < 4:
            ref = jnp.maximum(ref, 0.0)

    # Exact path (f32 MXU operands): strict correctness check.
    out_f32 = net_forward(x, prepare_params(params, use_bf16=False))
    jax.block_until_ready(out_f32)
    assert out_f32.shape == (batch, 1)
    assert jnp.allclose(out_f32, ref, atol=1e-5, rtol=1e-5)

    # Fast path (bf16 MXU operands, f32 accumulate): default for throughput.
    # Tolerance relaxed for the bf16 operand rounding (precision tradeoff, not a bug).
    out_bf16 = net_forward(x, prepare_params(params, use_bf16=True))
    jax.block_until_ready(out_bf16)
    assert out_bf16.shape == (batch, 1)
    assert jnp.allclose(out_bf16, ref, atol=5e-2, rtol=2e-2)

    print("KERNEL_OK")
</pallas_src>

<mosaic_0001>
module attributes {stable_mosaic.version = 11 : i64} {
  func.func @mlp_kernel(%arg0: i32, %arg1: memref<1x8xf32, #tpu.memory_space<vmem>>, %arg2: memref<16x1xf32, #tpu.memory_space<vmem>>, %arg3: memref<16x1xf32, #tpu.memory_space<vmem>>, %arg4: memref<128x16xf32, #tpu.memory_space<vmem>>, %arg5: memref<16x128xf32, #tpu.memory_space<vmem>>, %arg6: memref<16x1xf32, #tpu.memory_space<vmem>>, %arg7: memref<1x8xf32, #tpu.memory_space<vmem>>) attributes {dimension_semantics = [#tpu.dimension_semantics<parallel>], iteration_bounds = array<i64: 1>, scalar_prefetch = 0 : i64, scratch_operands = 0 : i64, tpu.core_type = #tpu.core_type<tc>, window_params = [{transform_indices = @transform_0, window_bounds = array<i64: 1, 8>}, {pipeline_mode = #tpu.pipeline_mode<synchronous>, transform_indices = @transform_1, window_bounds = array<i64: 16, 1>}, {pipeline_mode = #tpu.pipeline_mode<synchronous>, transform_indices = @transform_2, window_bounds = array<i64: 16, 1>}, {pipeline_mode = #tpu.pipeline_mode<synchronous>, transform_indices = @transform_3, window_bounds = array<i64: 128, 16>}, {pipeline_mode = #tpu.pipeline_mode<synchronous>, transform_indices = @transform_4, window_bounds = array<i64: 16, 128>}, {pipeline_mode = #tpu.pipeline_mode<synchronous>, transform_indices = @transform_5, window_bounds = array<i64: 16, 1>}, {transform_indices = @transform_6, window_bounds = array<i64: 1, 8>}]} {
    %c0 = arith.constant 0 : index
    %c0_0 = arith.constant 0 : index
    %0 = vector.load %arg1[%c0, %c0_0] : memref<1x8xf32, #tpu.memory_space<vmem>>, vector<1x8xf32>
    %c0_1 = arith.constant 0 : index
    %c0_2 = arith.constant 0 : index
    %1 = vector.load %arg2[%c0_1, %c0_2] : memref<16x1xf32, #tpu.memory_space<vmem>>, vector<16x1xf32>
    %2 = vector.broadcast %1 : vector<16x1xf32> to vector<16x8xf32>
    %3 = vector.broadcast %0 : vector<1x8xf32> to vector<16x8xf32>
    %4 = arith.mulf %2, %3 : vector<16x8xf32>
    %c0_3 = arith.constant 0 : index
    %c0_4 = arith.constant 0 : index
    %5 = vector.load %arg3[%c0_3, %c0_4] : memref<16x1xf32, #tpu.memory_space<vmem>>, vector<16x1xf32>
    %6 = vector.broadcast %5 : vector<16x1xf32> to vector<16x8xf32>
    %7 = arith.addf %4, %6 : vector<16x8xf32>
    %cst = arith.constant 0.000000e+00 : f32
    %8 = vector.broadcast %cst : f32 to vector<16x8xf32>
    %9 = arith.maximumf %7, %8 : vector<16x8xf32>
    %c0_5 = arith.constant 0 : index
    %c0_6 = arith.constant 0 : index
    %10 = vector.load %arg4[%c0_5, %c0_6] : memref<128x16xf32, #tpu.memory_space<vmem>>, vector<128x16xf32>
    %cst_7 = arith.constant dense<0.000000e+00> : vector<128x8xf32>
    %11 = tpu.matmul %10, %9, %cst_7 {dimension_numbers = #tpu.dot_dimension_numbers<[1], [0], [0], [1], [0, 0, 1, 1], [], []>} : vector<128x16xf32>, vector<16x8xf32>, vector<128x8xf32> -> vector<128x8xf32>
    %cst_8 = arith.constant 0.000000e+00 : f32
    %12 = vector.broadcast %cst_8 : f32 to vector<128x8xf32>
    %13 = arith.maximumf %11, %12 : vector<128x8xf32>
    %c0_9 = arith.constant 0 : index
    %c0_10 = arith.constant 0 : index
    %14 = vector.load %arg5[%c0_9, %c0_10] : memref<16x128xf32, #tpu.memory_space<vmem>>, vector<16x128xf32>
    %cst_11 = arith.constant dense<0.000000e+00> : vector<16x8xf32>
    %15 = tpu.matmul %14, %13, %cst_11 {dimension_numbers = #tpu.dot_dimension_numbers<[1], [0], [0], [1], [0, 0, 1, 1], [], []>} : vector<16x128xf32>, vector<128x8xf32>, vector<16x8xf32> -> vector<16x8xf32>
    %cst_12 = arith.constant 0.000000e+00 : f32
    %16 = vector.broadcast %cst_12 : f32 to vector<16x8xf32>
    %17 = arith.maximumf %15, %16 : vector<16x8xf32>
    %c0_13 = arith.constant 0 : index
    %c0_14 = arith.constant 0 : index
    %18 = vector.load %arg6[%c0_13, %c0_14] : memref<16x1xf32, #tpu.memory_space<vmem>>, vector<16x1xf32>
    %19 = vector.broadcast %18 : vector<16x1xf32> to vector<16x8xf32>
    %20 = arith.mulf %19, %17 : vector<16x8xf32>
    %cst_15 = arith.constant dense<0.000000e+00> : vector<8xf32>
    %21 = vector.multi_reduction <add>, %20, %cst_15 [0] : vector<16x8xf32> to vector<8xf32>
    %22 = vector.shape_cast %21 : vector<8xf32> to vector<1x8xf32>
    %c0_16 = arith.constant 0 : index
    %c0_17 = arith.constant 0 : index
    %23 = vector.load %arg7[%c0_16, %c0_17] : memref<1x8xf32, #tpu.memory_space<vmem>>, vector<1x8xf32>
    tpu.vector_store %arg7[%c0_16, %c0_17], %22 {strides = array<i32>} : memref<1x8xf32, #tpu.memory_space<vmem>>, vector<1x8xf32>,
    return
  }
  func.func @transform_0(%arg0: i32) -> (i32, i32) {
    %c0_i32 = arith.constant 0 : i32
    %c0_i32_0 = arith.constant 0 : i32
    return %c0_i32, %arg0 : i32, i32
  }
  func.func @transform_1(%arg0: i32) -> (i32, i32) {
    %c0_i32 = arith.constant 0 : i32
    %c0_i32_0 = arith.constant 0 : i32
    %c0_i32_1 = arith.constant 0 : i32
    return %c0_i32, %c0_i32_0 : i32, i32
  }
  func.func @transform_2(%arg0: i32) -> (i32, i32) {
    %c0_i32 = arith.constant 0 : i32
    %c0_i32_0 = arith.constant 0 : i32
    %c0_i32_1 = arith.constant 0 : i32
    return %c0_i32, %c0_i32_0 : i32, i32
  }
  func.func @transform_3(%arg0: i32) -> (i32, i32) {
    %c0_i32 = arith.constant 0 : i32
    %c0_i32_0 = arith.constant 0 : i32
    %c0_i32_1 = arith.constant 0 : i32
    return %c0_i32, %c0_i32_0 : i32, i32
  }
  func.func @transform_4(%arg0: i32) -> (i32, i32) {
    %c0_i32 = arith.constant 0 : i32
    %c0_i32_0 = arith.constant 0 : i32
    %c0_i32_1 = arith.constant 0 : i32
    return %c0_i32, %c0_i32_0 : i32, i32
  }
  func.func @transform_5(%arg0: i32) -> (i32, i32) {
    %c0_i32 = arith.constant 0 : i32
    %c0_i32_0 = arith.constant 0 : i32
    %c0_i32_1 = arith.constant 0 : i32
    return %c0_i32, %c0_i32_0 : i32, i32
  }
  func.func @transform_6(%arg0: i32) -> (i32, i32) {
    %c0_i32 = arith.constant 0 : i32
    %c0_i32_0 = arith.constant 0 : i32
    return %c0_i32, %arg0 : i32, i32
  }
}

</mosaic_0001>

<bundles_post_ra>
// kernel: tpu_custom_call.1
= control target key start
LH: loop header
LB: loop body
LE: loop exit
PB: predicated region body
PF: predicated region fallthrough
CT: control target
= control target key end

     0   :  { %v586_v2 = vmov 0   ;;  %s726_s0 = inlined_call_operand.vmem [shape: f32[1,8], index: 0, kind: input, shape index: {}]   ;;  %s727_s1 = inlined_call_operand.vmem [shape: f32[16,1], index: 1, kind: input, shape index: {}]   ;;  %s728_s2 = inlined_call_operand.vmem [shape: f32[16,1], index: 2, kind: input, shape index: {}]   ;;  %s729_s3 = inlined_call_operand.vmem [shape: f32[128,16], index: 3, kind: input, shape index: {}]   ;;  %s730_s4 = inlined_call_operand.vmem [shape: f32[16,128], index: 4, kind: input, shape index: {}]   ;;  %s731_s5 = inlined_call_operand.vmem [shape: f32[16,1], index: 5, kind: input, shape index: {}]   ;;  %s732_s6 = inlined_call_operand.hbm [shape: f32[1,8], index: 6, kind: output, shape index: {}]  }
   0x1   :  { %v45_v0 = vld [vmem:[%s728_s2] sm:$0xff]  ;;  %561 = vset.pattern.permute.xlu1 %v586_v2  ;;  %560 = vset.pattern.permute.xlu0 %v586_v2 }
   0x2   :  { %v25_v1 = vld [vmem:[%s727_s1] sm:$0xff]  ;;  %49 = vperm.xlu1 %561, %v45_v0  }
   0x3   :  { %29 = vperm.xlu0 %560, %v25_v1  }
   0x4   :  { %11 = vsyncpa [#allocation3], 0  ;;  %v46_v3 = vld [vmem:[%s728_s2 + $0x8] sm:$0xff]  ;;  %v366_v6 = vld [vmem:[%s731_s5] sm:$0xff]  ;;  %vm77_vm0 = vcmask 130048   ;;  %vm380_vm1 = vcmask 64512  }
   0x5   :  { %v26_v4 = vld [vmem:[%s727_s1 + $0x8] sm:$0xff]  ;;  %v61_v7 = vld [vmem:[%s729_s3] sm:$0xff]  ;;  %v63_v21 = vld [vmem:[%s729_s3 + $0x10] sm:$0xff]  ;;  %s587_s14 = smov [#allocation2]   ;;  %vm390_vm2 = vcmask 57344  }
   0x6   :  { %54 = vperm.xlu1 %561, %v46_v3   ;;  %v367_v5 = vld [vmem:[%s731_s5 + $0x8] sm:$0xff]  ;;  %463 = vmatprep.mubr.msk.f32.mxu0 %vm77_vm0, %v61_v7  ;;  %v406_v8 = vld [vmem:[%s726_s0] ss:$0 sm:$0xff]  ;;  %v64_v22 = vld [vmem:[%s729_s3 + $0x18] sm:$0xff]  ;;  %s398_s15 = sshll.u32 %s587_s14, 4  ;;  %s399_s15 = int_to_ptr.vmem [resolvable:$true] %s398_s15 }
   0x7   :  { %34 = vperm.xlu0 %560, %v26_v4   ;;  %v62_v20 = vld [vmem:[%s729_s3 + $0x8] sm:$0xff]  ;;  %v65_v23 = vld [vmem:[%s729_s3 + $0x20] sm:$0xff]  ;;  %v67_v25 = vld [vmem:[%s729_s3 + $0x30] sm:$0xff]  ;;  %s566_s16 = scalar_lea.vmem %s399_s15, 32  ;;  %p567_p1 = scmp.lt.s32.totalorder %s399_s15, %s399_s15 }
   0x8   :  { %v66_v24 = vld [vmem:[%s729_s3 + $0x28] sm:$0xff]  ;;  %v68_v26 = vld [vmem:[%s729_s3 + $0x38] sm:$0xff]  ;;  %v69_v27 = vld [vmem:[%s729_s3 + $0x40] sm:$0xff] }
   0x9   :  { %v70_v28 = vld [vmem:[%s729_s3 + $0x48] sm:$0xff]  ;;  %v71_v29 = vld [vmem:[%s729_s3 + $0x50] sm:$0xff]  ;;  %v72_v30 = vld [vmem:[%s729_s3 + $0x58] sm:$0xff] }
   0xa   :  { %375 = vperm.xlu1 %561, %v367_v5   ;;  %v73_v31 = vld [vmem:[%s729_s3 + $0x60] sm:$0xff]  ;;  %v74_v32 = vld [vmem:[%s729_s3 + $0x68] sm:$0xff]  ;;  %v75_v33 = vld [vmem:[%s729_s3 + $0x70] sm:$0xff] }
   0xb   :  { %370 = vperm.xlu0 %560, %v366_v6   ;;  %v76_v34 = vld [vmem:[%s729_s3 + $0x78] sm:$0xff]  ;;  %v287_v35 = vld [vmem:[%s730_s4] sm:$0xff] }
   0xc   :  { %519 = vmatprep.mubr.f32.mxu1 %v287_v35 }
  0x81   :  { %v50_v9 = vpop.permute.xlu1 %49 }
  0x82   :  { %v30_v10 = vpop.permute.xlu0 %29 }
  0x83   :  { %v43_v11 = vmul.f32 %v406_v8, %v30_v10 }
  0x85   :  { %v57_v13 = vadd.f32 %v50_v9, %v43_v11  ;;  %v55_v15 = vpop.permute.xlu1 %54 }
  0x86   :  { %v35_v12 = vpop.permute.xlu0 %34 }
  0x87   :  { %v44_v14 = vmul.f32 %v406_v8, %v35_v12  ;;  %v59_v17 = vmax.f32 %v57_v13, 0.0  ;;  %v288_v12 = vld [vmem:[%s730_s4 + $0x8] sm:$0xff]  ;;  %s562_s4 = scalar_lea.vmem %s399_s15, 16 }
  0x88   :  { %p563_p0 = scmp.ne.s32.totalorder %s399_s15, %s562_s4  ;;  %p568_p2 = scmp.lt.s32.totalorder %s566_s16, %s562_s4 }
  0x89   :  { %v58_v16 = vadd.f32 %v55_v15, %v44_v14 }
  0x8a   :  { %p569_p3 = por %p568_p2, %p567_p1 }
  0x8b   :  { %v60_v18 = vmax.f32 %v58_v16, 0.0  ;;  %v376_v16 = vpop.permute.xlu1 %375 }
  0x8c   :  { %p570_p4 = pnand %p569_p3, %p563_p0 }
  0x8d   :  { %v522_v19 = vpack.c.bf16 %v60_v18, %v59_v17  ;;  %v371_v18 = vpop.permute.xlu0 %370 }
  0x8f   :  { %523 = vmatprep.subr.bf16.mxu0 %v522_v19 }
  0x90   :  { %525 = vmatpush3.bf16.msra.mxu0 %v522_v19 }
  0x93   :  { %464 = vmatmul.mubr.msk.f32.vlgmr.msra.gmra.mrb[0].mxu0 %vm77_vm0, %v62_v20 }
  0x94   :  { %466 = vmatprep.mubr.msk.f32.mxu0 %vm77_vm0, %v63_v21 }
  0x97   :  { %467 = vmatmul.mubr.msk.f32.gmra.mrb[2].mxu0 %vm77_vm0, %v64_v22 }
  0x98   :  { %469 = vmatprep.mubr.msk.f32.mxu0 %vm77_vm0, %v65_v23 }
  0x9b   :  { %470 = vmatmul.mubr.msk.f32.gmra.mrb[4].mxu0 %vm77_vm0, %v66_v24 }
  0x9c   :  { %472 = vmatprep.mubr.msk.f32.mxu0 %vm77_vm0, %v67_v25 }
  0x9f   :  { %473 = vmatmul.mubr.msk.f32.gmra.mrb[6].mxu0 %vm77_vm0, %v68_v26 }
  0xa0   :  { %475 = vmatprep.mubr.msk.f32.mxu0 %vm77_vm0, %v69_v27 }
  0xa3   :  { %476 = vmatmul.mubr.msk.f32.gmra.mrb[8].mxu0 %vm77_vm0, %v70_v28 }
  0xa4   :  { %478 = vmatprep.mubr.msk.f32.mxu0 %vm77_vm0, %v71_v29 }
  0xa7   :  { %479 = vmatmul.mubr.msk.f32.gmra.mrb[10].mxu0 %vm77_vm0, %v72_v30 }
  0xa8   :  { %481 = vmatprep.mubr.msk.f32.mxu0 %vm77_vm0, %v73_v31 }
  0xab   :  { %482 = vmatmul.mubr.msk.f32.gmra.mrb[12].mxu0 %vm77_vm0, %v74_v32 }
  0xac   :  { %484 = vmatprep.mubr.msk.f32.mxu0 %vm77_vm0, %v75_v33 }
  0xaf   :  { %485 = vmatmul.mubr.msk.f32.gmra.mrb[14].mxu0 %vm77_vm0, %v76_v34 }
 0x166   :  { %v465_v36 = vpop.f32.mrb[0].mxu0 }
 0x167   :  { %v272_v37 = vmax.f32 %v465_v36, 0.0  ;;  %v192_v38 = vpop.f32.mrb[1].mxu0 }
 0x168   :  { %v271_v39 = vmax.f32 %v192_v38, 0.0 }
 0x16a   :  { %v468_v40 = vpop.f32.mrb[2].mxu0  ;;  %v526_v41 = vpack.c.bf16 %v272_v37, %v271_v39 }
 0x16b   :  { %v274_v42 = vmax.f32 %v468_v40, 0.0  ;;  %v202_v43 = vpop.f32.mrb[3].mxu0 }
 0x16c   :  { %v273_v44 = vmax.f32 %v202_v43, 0.0  ;;  %527 = vmatprep.subr.bf16.mxu1 %v526_v41 }
 0x16d   :  { %529 = vmatpush3.bf16.msra.mxu1 %v526_v41 }
 0x16e   :  { %v530_v45 = vpack.c.bf16 %v274_v42, %v273_v44  ;;  %v471_v46 = vpop.f32.mrb[4].mxu0 }
 0x16f   :  { %v276_v47 = vmax.f32 %v471_v46, 0.0  ;;  %v212_v48 = vpop.f32.mrb[5].mxu0 }
 0x170   :  { %v275_v49 = vmax.f32 %v212_v48, 0.0  ;;  %531 = vmatprep.subr.bf16.mxu1 %v530_v45 }
 0x171   :  { %533 = vmatpush3.bf16.msra.mxu1 %v530_v45 }
 0x172   :  { %v534_v50 = vpack.c.bf16 %v276_v47, %v275_v49  ;;  %v474_v51 = vpop.f32.mrb[6].mxu0 }
 0x173   :  { %v278_v52 = vmax.f32 %v474_v51, 0.0  ;;  %v222_v53 = vpop.f32.mrb[7].mxu0 }
 0x174   :  { %v277_v54 = vmax.f32 %v222_v53, 0.0  ;;  %535 = vmatprep.subr.bf16.mxu1 %v534_v50 }
 0x175   :  { %537 = vmatpush3.bf16.msra.mxu1 %v534_v50 }
 0x176   :  { %v538_v55 = vpack.c.bf16 %v278_v52, %v277_v54  ;;  %v477_v56 = vpop.f32.mrb[8].mxu0 }
 0x177   :  { %v280_v57 = vmax.f32 %v477_v56, 0.0  ;;  %v232_v58 = vpop.f32.mrb[9].mxu0 }
 0x178   :  { %v279_v59 = vmax.f32 %v232_v58, 0.0  ;;  %539 = vmatprep.subr.bf16.mxu1 %v538_v55 }
 0x179   :  { %541 = vmatpush3.bf16.msra.mxu1 %v538_v55 }
 0x17a   :  { %v542_v60 = vpack.c.bf16 %v280_v57, %v279_v59  ;;  %v480_v61 = vpop.f32.mrb[10].mxu0 }
 0x17b   :  { %v282_v62 = vmax.f32 %v480_v61, 0.0  ;;  %v242_v63 = vpop.f32.mrb[11].mxu0 }
 0x17c   :  { %v281_v0 = vmax.f32 %v242_v63, 0.0  ;;  %543 = vmatprep.subr.bf16.mxu1 %v542_v60 }
 0x17d   :  { %545 = vmatpush3.bf16.msra.mxu1 %v542_v60 }
 0x17e   :  { %v546_v1 = vpack.c.bf16 %v282_v62, %v281_v0  ;;  %v483_v2 = vpop.f32.mrb[12].mxu0 }
 0x17f   :  { %v284_v3 = vmax.f32 %v483_v2, 0.0  ;;  %v252_v4 = vpop.f32.mrb[13].mxu0 }
 0x180   :  { %v283_v5 = vmax.f32 %v252_v4, 0.0  ;;  %547 = vmatprep.subr.bf16.mxu1 %v546_v1 }
 0x181   :  { %549 = vmatpush3.bf16.msra.mxu1 %v546_v1 }
 0x182   :  { %v550_v6 = vpack.c.bf16 %v284_v3, %v283_v5  ;;  %v486_v7 = vpop.f32.mrb[14].mxu0 }
 0x183   :  { %v286_v8 = vmax.f32 %v486_v7, 0.0  ;;  %v262_v9 = vpop.f32.mrb[15].mxu0 }
 0x184   :  { %v285_v10 = vmax.f32 %v262_v9, 0.0  ;;  %551 = vmatprep.subr.bf16.mxu1 %v550_v6 }
 0x185   :  { %553 = vmatpush3.bf16.msra.mxu1 %v550_v6 }
 0x186   :  { %v554_v11 = vpack.c.bf16 %v286_v8, %v285_v10 }
 0x188   :  { %555 = vmatprep.subr.bf16.mxu1 %v554_v11 }
 0x189   :  { %557 = vmatpush3.bf16.msra.mxu1 %v554_v11 }
 0x18c   :  { %520 = vmatmul.mubr.f32.vlgmr.msra.gmra.mrb[0].mxu1 %v288_v12 }
 0x25f   :  { %v521_v13 = vpop.f32.mrb[0].mxu1 }
 0x260   :  { %v365_v14 = vmax.f32 %v521_v13, 0.0  ;;  %v355_v15 = vpop.f32.mrb[1].mxu1 }
 0x261   :  { %v364_v17 = vmax.f32 %v355_v15, 0.0 }
 0x262   :  { %v379_v19 = vmul.f32 %v376_v16, %v365_v14 }
 0x263   :  { %v378_v20 = vmul.f32 %v371_v18, %v364_v17 }
 0x264   :  { %v382_v21 = vsel %vm380_vm1, %v379_v19, 0.0 }
 0x265   :  { %v381_v22 = vsel %vm380_vm1, %v378_v20, 0.0 }
 0x266   :  { %v383_v23 = vadd.f32 %v382_v21, %v381_v22 }
 0x268   :  { %v384_v24 = vrot.slane %v383_v23, 4 }
 0x26a   :  { %v385_v25 = vadd.f32 %v384_v24, %v383_v23 }
 0x26c   :  { %v386_v26 = vrot.slane %v385_v25, 2 }
 0x26e   :  { %v387_v27 = vadd.f32 %v386_v26, %v385_v25 }
 0x270   :  { %v388_v28 = vrot.slane %v387_v27, 1 }
 0x272   :  { %v389_v29 = vadd.f32 %v388_v28, %v387_v27 }
 0x274   :  { %391 = vst.msk [vmem:[#allocation2] sm:$0x1] %vm390_vm2, %v389_v29 }
 0x275   :  { %573 = shalt.err (!%p570_p4)
}
 0x276   :  { %s574_s19 = scalar_lea.hbm %s732_s6, 16 }
 0x277   :  { %p575_p5 = scmp.ne.s32.totalorder %s732_s6, %s574_s19  ;;  %p578_p6 = scmp.lt.u32.totalorder %s574_s19, %s732_s6 }
 0x279   :  { %p580_p7 = pnand %p578_p6, %p575_p5 }
 0x27b   :  { %583 = shalt.err (!%p580_p7)
}
 0x27c   :  { %401 = dma.vmem_to_hbm [thread:$0]  %s399_s15, 16, %s732_s6, [#allocation3]  }
 0x27d   :  { %584 = dma.done.wait [#allocation3], 16  }
 0x27e   :  { %585 = vsyncadd [#allocation3], 4294967280 }
 0x27f   :  { %405 = vsyncpa [#allocation3], 1 }

</bundles_post_ra>
